<compile_context>
chip_gen: v5e
topology: v5e:2x2
jax: 0.10.0
libtpu: 0.0.40
codegen_flags: <defaults>
</compile_context>

<pallas_src>
import functools
import math

import jax
import jax.numpy as jnp
from jax.experimental import pallas as pl
from jax.experimental.pallas import tpu as pltpu


def _round_up(x, m):
    return ((x + m - 1) // m) * m


# ----------------------------- Pallas kernel --------------------------------
def mirt_kernel(
    xt_ref,    # (TB, K)  gathered, pre-sigmoided theta rows (bf16)
    xa_ref,    # (TB, K)  gathered, pre-sigmoided a rows     (bf16)
    bb_ref,    # (1, TB)  gathered, pre-sigmoided item difficulty (f32, lane-dense)
    w1p_ref,   # (K, 2L)  fc1.weight^T, zero-padded in cols [L:2L] (bf16)
    w2p_ref,   # (K, 2L)  fc2.weight^T, zero-padded in cols [0:L]  (bf16)
    bias_ref,  # (1, 2L)  [fc1.bias | fc2.bias] (f32)
    out_ref,   # (1, TB)  irt2pl output (lane-dense)
):
    f32 = jnp.float32
    two_l = bias_ref.shape[1]
    l = two_l // 2

    # Fused hidden block: h[:, :L] = fc1(theta_sig), h[:, L:] = fc2(a_sig).
    # Batch-major (M=TB, K) @ (K, N=2L) is the MXU-native orientation, so no
    # input transpose is needed; bf16 operands, f32 accumulation.
    # (For bit-closer parity with fp32 PyTorch, pass precision=HIGHEST here.)
    h = (jnp.dot(xt_ref[...], w1p_ref[...], preferred_element_type=f32)
         + jnp.dot(xa_ref[...], w2p_ref[...], preferred_element_type=f32)
         + bias_ref[...])                                         # (TB, 2L) f32

    # One small transpose so the elementwise tail + output are lane-dense
    # (batch on the 128-lane axis).  The XLU slot is otherwise idle here.
    ht = jnp.transpose(h)                                         # (2L, TB)

    new_theta = jax.nn.sigmoid(ht[:l, :])                         # (L, TB)
    new_a = jax.nn.sigmoid(ht[l:, :])                             # (L, TB)

    # irt2pl with pre-folded sigmoid(b): sigmoid(sum(a * theta) - b_sig).
    s = jnp.sum(new_theta * new_a, axis=0, keepdims=True)         # (1, TB)
    out_ref[...] = jax.nn.sigmoid(s - bb_ref[...])                # (1, TB)


def mirt_forward_pallas(xt, xa, bb, w1p, w2p, bias, *, tile_b):
    bp, k = xt.shape
    two_l = w1p.shape[1]
    assert bp % tile_b == 0 and tile_b % 128 == 0

    def row_spec():                                   # batch-major activations
        return pl.BlockSpec((tile_b, k), lambda i: (i, 0))

    def lane_spec():                                  # lane-dense (1, TB) rows
        return pl.BlockSpec((1, tile_b), lambda i: (0, i))

    def const_spec(shape):                            # resident weights/bias
        return pl.BlockSpec(shape, lambda i: (0, 0))

    nbytes = lambda a: a.size * a.dtype.itemsize
    cost = pl.CostEstimate(
        flops=2 * 2 * bp * k * two_l + 4 * bp * two_l,
        transcendentals=bp * (two_l + 1),
        bytes_accessed=(nbytes(xt) + nbytes(xa) + nbytes(bb)
                        + nbytes(w1p) + nbytes(w2p) + nbytes(bias) + bp * 4),
    )

    return pl.pallas_call(
        mirt_kernel,
        out_shape=jax.ShapeDtypeStruct((1, bp), jnp.float32),
        grid=(bp // tile_b,),
        in_specs=[
            row_spec(),            # xt
            row_spec(),            # xa
            lane_spec(),           # bb
            const_spec(w1p.shape),  # w1p (resident)
            const_spec(w2p.shape),  # w2p (resident)
            const_spec(bias.shape),  # bias (resident)
        ],
        out_specs=lane_spec(),
        compiler_params=pltpu.CompilerParams(
            dimension_semantics=("parallel",),
            vmem_limit_bytes=32 * 1024 * 1024,   # headroom; ~8 MB used at TB=8192
        ),
        cost_estimate=cost,
    )(xt, xa, bb, w1p, w2p, bias)


# ----------------------------- Model wrapper ---------------------------------
class SourceMIRTNetPallas:
    """Deterministic parameters + Source_MIRTNet forward via the Pallas kernel."""

    def __init__(self, user_num, item_num, latent_dim, pp_dim, s_ranges, key,
                 tile_b=8192):
        assert tile_b % 128 == 0 and tile_b >= 128
        self.user_num = user_num
        self.item_num = item_num
        self.latent_dim = latent_dim
        self.pp_dim = pp_dim
        self.s_ranges = list(s_ranges)
        self.tile_b = int(tile_b)

        S = len(self.s_ranges)
        L, P = latent_dim, pp_dim
        K = P + L
        f32 = jnp.float32
        bf16 = jnp.bfloat16

        keys = iter(jax.random.split(key, 7 + 2 * S))
        nk = lambda: next(keys)

        # Raw parameters (xavier-uniform-like / U[0,1) / randn), kept in f32 for
        # the spec reference.
        a_par = jax.random.uniform(nk(), (item_num, L), f32, -1.0, 1.0) \
            * math.sqrt(6.0 / (item_num + L))
        exer = [jax.random.uniform(nk(), (P,), f32) for _ in range(S)]
        thetas = [jax.random.uniform(nk(), (user_num, L), f32, -1.0, 1.0)
                  * math.sqrt(6.0 / (user_num + L)) for _ in range(S)]
        prompt_theta = jax.random.uniform(nk(), (user_num, P), f32, -1.0, 1.0) \
            * math.sqrt(6.0 / (user_num + P))
        b_emb = jax.random.normal(nk(), (item_num,), f32)

        bound = 1.0 / math.sqrt(float(K))
        self.w1 = jax.random.uniform(nk(), (L, K), f32, -bound, bound)
        self.b1 = jax.random.uniform(nk(), (L,), f32, -bound, bound)
        self.w2 = jax.random.uniform(nk(), (L, K), f32, -bound, bound)
        self.b2 = jax.random.uniform(nk(), (L,), f32, -bound, bound)

        # --- fold the constant table constructions done in torch.forward ----
        prompt_rep = jnp.tile(prompt_theta, (S, 1))                  # (S*U, P)
        theta_cat = jnp.concatenate(thetas, axis=0)                  # (S*U, L)
        self.theta_table_raw = jnp.concatenate([prompt_rep, theta_cat], axis=1)

        temp_vectors = jnp.concatenate(
            [jnp.tile(v[None, :], (hi - lo + 1, 1))
             for v, (lo, hi) in zip(exer, self.s_ranges)], axis=0)   # (item, P)
        assert temp_vectors.shape[0] == item_num, "s_ranges must cover item_num rows"
        self.a_table_raw = jnp.concatenate([temp_vectors, a_par], axis=1)
        self.b_raw = b_emb                                           # (item,)

        # Pre-fold the constant sigmoids (exact for inference; commutes with the
        # row gather) and store the dominant tables in bf16 for the kernel.
        self.theta_sig = jax.nn.sigmoid(self.theta_table_raw).astype(bf16)  # (S*U, K)
        self.a_sig = jax.nn.sigmoid(self.a_table_raw).astype(bf16)          # (item, K)
        self.b_sig = jax.nn.sigmoid(self.b_raw)                             # (item,) f32

        # Merged fc weights: h[:, :L] = xt @ w1.T + b1, h[:, L:] = xa @ w2.T + b2.
        w1t = self.w1.T                                              # (K, L)
        w2t = self.w2.T
        zeros = jnp.zeros_like(w1t)
        self.w1p = jnp.concatenate([w1t, zeros], axis=1).astype(bf16)  # (K, 2L)
        self.w2p = jnp.concatenate([zeros, w2t], axis=1).astype(bf16)  # (K, 2L)
        self.bias_row = jnp.concatenate([self.b1, self.b2])[None, :]   # (1, 2L) f32

    @functools.partial(jax.jit, static_argnums=0)
    def forward(self, user, item):
        # NOTE: `self` is a static (identity-hashed) jit arg: do not mutate
        # parameters after the first call; each batch size compiles once.
        B = user.shape[0]
        b128 = _round_up(B, 128)
        tile_b = min(self.tile_b, b128)
        # Keep >= ~4 grid steps for large batches so both v7x TensorCores get
        # work and the DMA pipeline stays busy; tiny batches use one 128 tile.
        if b128 >= 4 * 128 and b128 // tile_b < 4:
            tile_b = max(128, _round_up(-(-b128 // 4), 128))
        B_pad = _round_up(B, tile_b)

        user_p = jnp.pad(user, (0, B_pad - B))
        item_p = jnp.pad(item, (0, B_pad - B))

        # One gather pass per table; no transposes (the kernel handles layout).
        xt = self.theta_sig[user_p]                    # (B_pad, K) bf16
        xa = self.a_sig[item_p]                        # (B_pad, K) bf16
        bb = self.b_sig[item_p][None, :]               # (1, B_pad) f32

        out = mirt_forward_pallas(xt, xa, bb, self.w1p, self.w2p,
                                  self.bias_row, tile_b=tile_b)      # (1, B_pad)
        return out[0, :B]

    # Pure-JAX replica of the exact math the kernel does (folded bf16 tables).
    def forward_folded_ref(self, user, item):
        f32 = jnp.float32
        xt = self.theta_sig[user].astype(f32)
        xa = self.a_sig[item].astype(f32)
        h = xt @ self.w1p.astype(f32) + xa @ self.w2p.astype(f32) + self.bias_row
        l = self.latent_dim
        new_theta = jax.nn.sigmoid(h[:, :l])
        new_a = jax.nn.sigmoid(h[:, l:])
        s = jnp.sum(new_theta * new_a, axis=-1)
        return jax.nn.sigmoid(s - self.b_sig[item])

    # Pure-JAX mirror of the original PyTorch forward (f32, unfolded).
    def forward_spec_ref(self, user, item):
        new_theta = jax.nn.sigmoid(self.theta_table_raw[user]) @ self.w1.T + self.b1
        new_a = jax.nn.sigmoid(self.a_table_raw[item]) @ self.w2.T + self.b2
        new_b = self.b_raw[item]
        new_a = jax.nn.sigmoid(new_a)           # a_range = 1 path
        new_b = jax.nn.sigmoid(new_b)
        new_theta = jax.nn.sigmoid(new_theta)
        return 1.0 / (1.0 + jnp.exp(-jnp.sum(new_a * new_theta, axis=-1) + new_b))


# ----------------------------------- main ------------------------------------
if __name__ == "__main__":
    key = jax.random.PRNGKey(0)
    k_model, k_user, k_item = jax.random.split(key, 3)

    USER_NUM, ITEM_NUM = 16, 20
    LATENT_DIM, PP_DIM = 16, 8
    S_RANGES = [(0, 7), (8, 13), (14, 19)]   # range lengths sum to ITEM_NUM
    BATCH = 8

    model = SourceMIRTNetPallas(USER_NUM, ITEM_NUM, LATENT_DIM, PP_DIM,
                                S_RANGES, k_model)

    # Source_MIRTNet's user index addresses the stacked (S * user_num) theta table.
    user = jax.random.randint(k_user, (BATCH,), 0,
                              USER_NUM * len(S_RANGES), dtype=jnp.int32)
    item = jax.random.randint(k_item, (BATCH,), 0, ITEM_NUM, dtype=jnp.int32)

    out = jax.block_until_ready(model.forward(user, item))
    ref_folded = model.forward_folded_ref(user, item)
    ref_spec = model.forward_spec_ref(user, item)

    assert out.shape == (BATCH,)
    # Tight check: kernel vs a pure-JAX replica of the same folded/bf16 math.
    assert jnp.allclose(out, ref_folded, atol=5e-5, rtol=5e-5), (out, ref_folded)
    # Loose check: sigmoid-folding + bf16 table storage preserves the original
    # f32 semantics (tolerance is the bf16 storage error bound).
    assert jnp.allclose(out, ref_spec, atol=1e-2, rtol=0.0), (out, ref_spec)

    print("KERNEL_OK")
</pallas_src>

<mosaic_0001>
module attributes {stable_mosaic.version = 11 : i64} {
  func.func @mirt_kernel(%arg0: i32, %arg1: memref<128x24xbf16, #tpu.memory_space<vmem>>, %arg2: memref<128x24xbf16, #tpu.memory_space<vmem>>, %arg3: memref<1x128xf32, #tpu.memory_space<vmem>>, %arg4: memref<24x32xbf16, #tpu.memory_space<vmem>>, %arg5: memref<24x32xbf16, #tpu.memory_space<vmem>>, %arg6: memref<1x32xf32, #tpu.memory_space<vmem>>, %arg7: memref<1x128xf32, #tpu.memory_space<vmem>>) attributes {dimension_semantics = [#tpu.dimension_semantics<parallel>], iteration_bounds = array<i64: 1>, scalar_prefetch = 0 : i64, scratch_operands = 0 : i64, tpu.core_type = #tpu.core_type<tc>, window_params = [{transform_indices = @transform_0, window_bounds = array<i64: 128, 24>}, {transform_indices = @transform_1, window_bounds = array<i64: 128, 24>}, {transform_indices = @transform_2, window_bounds = array<i64: 1, 128>}, {pipeline_mode = #tpu.pipeline_mode<synchronous>, transform_indices = @transform_3, window_bounds = array<i64: 24, 32>}, {pipeline_mode = #tpu.pipeline_mode<synchronous>, transform_indices = @transform_4, window_bounds = array<i64: 24, 32>}, {pipeline_mode = #tpu.pipeline_mode<synchronous>, transform_indices = @transform_5, window_bounds = array<i64: 1, 32>}, {transform_indices = @transform_6, window_bounds = array<i64: 1, 128>}]} {
    %c0 = arith.constant 0 : index
    %c0_0 = arith.constant 0 : index
    %0 = vector.load %arg1[%c0, %c0_0] : memref<128x24xbf16, #tpu.memory_space<vmem>>, vector<128x24xbf16>
    %c0_1 = arith.constant 0 : index
    %c0_2 = arith.constant 0 : index
    %1 = vector.load %arg4[%c0_1, %c0_2] : memref<24x32xbf16, #tpu.memory_space<vmem>>, vector<24x32xbf16>
    %cst = arith.constant dense<0.000000e+00> : vector<128x32xf32>
    %2 = tpu.matmul %0, %1, %cst {dimension_numbers = #tpu.dot_dimension_numbers<[1], [0], [0], [1], [0, 0, 1, 1], [], []>} : vector<128x24xbf16>, vector<24x32xbf16>, vector<128x32xf32> -> vector<128x32xf32>
    %c0_3 = arith.constant 0 : index
    %c0_4 = arith.constant 0 : index
    %3 = vector.load %arg2[%c0_3, %c0_4] : memref<128x24xbf16, #tpu.memory_space<vmem>>, vector<128x24xbf16>
    %c0_5 = arith.constant 0 : index
    %c0_6 = arith.constant 0 : index
    %4 = vector.load %arg5[%c0_5, %c0_6] : memref<24x32xbf16, #tpu.memory_space<vmem>>, vector<24x32xbf16>
    %cst_7 = arith.constant dense<0.000000e+00> : vector<128x32xf32>
    %5 = tpu.matmul %3, %4, %cst_7 {dimension_numbers = #tpu.dot_dimension_numbers<[1], [0], [0], [1], [0, 0, 1, 1], [], []>} : vector<128x24xbf16>, vector<24x32xbf16>, vector<128x32xf32> -> vector<128x32xf32>
    %6 = arith.addf %2, %5 : vector<128x32xf32>
    %c0_8 = arith.constant 0 : index
    %c0_9 = arith.constant 0 : index
    %7 = vector.load %arg6[%c0_8, %c0_9] : memref<1x32xf32, #tpu.memory_space<vmem>>, vector<1x32xf32>
    %8 = vector.broadcast %7 : vector<1x32xf32> to vector<128x32xf32>
    %9 = arith.addf %6, %8 : vector<128x32xf32>
    %10 = tpu.transpose %9, [1, 0] : vector<128x32xf32> -> vector<32x128xf32>
    %11 = vector.extract_strided_slice %10 {offsets = [0, 0], sizes = [16, 128], strides = [1, 1]} : vector<32x128xf32> to vector<16x128xf32>
    %12 = arith.negf %11 : vector<16x128xf32>
    %13 = math.exp %12 : vector<16x128xf32>
    %cst_10 = arith.constant 1.000000e+00 : f32
    %14 = vector.broadcast %cst_10 : f32 to vector<16x128xf32>
    %15 = arith.addf %14, %13 : vector<16x128xf32>
    %16 = arith.divf %14, %15 : vector<16x128xf32>
    %17 = vector.extract_strided_slice %10 {offsets = [16, 0], sizes = [16, 128], strides = [1, 1]} : vector<32x128xf32> to vector<16x128xf32>
    %18 = arith.negf %17 : vector<16x128xf32>
    %19 = math.exp %18 : vector<16x128xf32>
    %cst_11 = arith.constant 1.000000e+00 : f32
    %20 = vector.broadcast %cst_11 : f32 to vector<16x128xf32>
    %21 = arith.addf %20, %19 : vector<16x128xf32>
    %22 = arith.divf %20, %21 : vector<16x128xf32>
    %23 = arith.mulf %16, %22 : vector<16x128xf32>
    %cst_12 = arith.constant dense<0.000000e+00> : vector<128xf32>
    %24 = vector.multi_reduction <add>, %23, %cst_12 [0] : vector<16x128xf32> to vector<128xf32>
    %25 = vector.shape_cast %24 : vector<128xf32> to vector<1x128xf32>
    %c0_13 = arith.constant 0 : index
    %c0_14 = arith.constant 0 : index
    %26 = vector.load %arg3[%c0_13, %c0_14] : memref<1x128xf32, #tpu.memory_space<vmem>>, vector<1x128xf32>
    %27 = arith.subf %25, %26 : vector<1x128xf32>
    %28 = arith.negf %27 : vector<1x128xf32>
    %29 = math.exp %28 : vector<1x128xf32>
    %cst_15 = arith.constant 1.000000e+00 : f32
    %30 = vector.broadcast %cst_15 : f32 to vector<1x128xf32>
    %31 = arith.addf %30, %29 : vector<1x128xf32>
    %32 = arith.divf %30, %31 : vector<1x128xf32>
    %c0_16 = arith.constant 0 : index
    %c0_17 = arith.constant 0 : index
    %33 = vector.load %arg7[%c0_16, %c0_17] : memref<1x128xf32, #tpu.memory_space<vmem>>, vector<1x128xf32>
    tpu.vector_store %arg7[%c0_16, %c0_17], %32 {strides = array<i32>} : memref<1x128xf32, #tpu.memory_space<vmem>>, vector<1x128xf32>,
    return
  }
  func.func @transform_0(%arg0: i32) -> (i32, i32) {
    %c0_i32 = arith.constant 0 : i32
    %c0_i32_0 = arith.constant 0 : i32
    return %arg0, %c0_i32 : i32, i32
  }
  func.func @transform_1(%arg0: i32) -> (i32, i32) {
    %c0_i32 = arith.constant 0 : i32
    %c0_i32_0 = arith.constant 0 : i32
    return %arg0, %c0_i32 : i32, i32
  }
  func.func @transform_2(%arg0: i32) -> (i32, i32) {
    %c0_i32 = arith.constant 0 : i32
    %c0_i32_0 = arith.constant 0 : i32
    return %c0_i32, %arg0 : i32, i32
  }
  func.func @transform_3(%arg0: i32) -> (i32, i32) {
    %c0_i32 = arith.constant 0 : i32
    %c0_i32_0 = arith.constant 0 : i32
    %c0_i32_1 = arith.constant 0 : i32
    return %c0_i32, %c0_i32_0 : i32, i32
  }
  func.func @transform_4(%arg0: i32) -> (i32, i32) {
    %c0_i32 = arith.constant 0 : i32
    %c0_i32_0 = arith.constant 0 : i32
    %c0_i32_1 = arith.constant 0 : i32
    return %c0_i32, %c0_i32_0 : i32, i32
  }
  func.func @transform_5(%arg0: i32) -> (i32, i32) {
    %c0_i32 = arith.constant 0 : i32
    %c0_i32_0 = arith.constant 0 : i32
    %c0_i32_1 = arith.constant 0 : i32
    return %c0_i32, %c0_i32_0 : i32, i32
  }
  func.func @transform_6(%arg0: i32) -> (i32, i32) {
    %c0_i32 = arith.constant 0 : i32
    %c0_i32_0 = arith.constant 0 : i32
    return %c0_i32, %arg0 : i32, i32
  }
}

</mosaic_0001>

<bundles_post_ra>
// kernel: forward.1
= control target key start
LH: loop header
LB: loop body
LE: loop exit
PB: predicated region body
PF: predicated region fallthrough
CT: control target
= control target key end

     0   :  { %vm136_vm0 = vcmask 1043456   ;;  %vm111_vm1 = vcmask 195584   ;;  %s779_s4 = inlined_call_operand.vmem [shape: bf16[24,32], index: 4, kind: input, shape index: {}]   ;;  %s780_s3 = inlined_call_operand.vmem [shape: bf16[24,32], index: 3, kind: input, shape index: {}]   ;;  %s781_s1 = inlined_call_operand.vmem [shape: bf16[128,24], index: 1, kind: input, shape index: {}]   ;;  %s782_s0 = inlined_call_operand.vmem [shape: bf16[128,24], index: 0, kind: input, shape index: {}]   ;;  %s783_s5 = inlined_call_operand.vmem [shape: f32[1,32], index: 5, kind: input, shape index: {}]   ;;  %s784_s2 = inlined_call_operand.vmem [shape: f32[1,128], index: 2, kind: input, shape index: {}]   ;;  %s785_s6 = inlined_call_operand.vmem [shape: f32[1,128], index: 6, kind: output, shape index: {}]  }
   0x1   :  { %v61_v0 = vld [vmem:[%s779_s4 + $0x8] sm:$0xf]  ;;  %v587_v8 = vld [vmem:[%s779_s4] sm:$0xff]  ;;  %v581_v16 = vld [vmem:[%s781_s1 + $0x10] sm:$0xff] }
   0x2   :  { %v42_v1 = vld [vmem:[%s780_s3 + $0x8] sm:$0xf]  ;;  %v107_v2 = vunpack.c.l.b16 %v61_v0  ;;  %v578_v9 = vld [vmem:[%s780_s3] sm:$0xff]  ;;  %v572_v17 = vld [vmem:[%s782_s0 + $0x10] sm:$0xff] }
   0x3   :  { %v234_v3 = vunpack.c.l.b16 %v42_v1  ;;  %v579_v10 = vld [vmem:[%s781_s1] sm:$0xff]  ;;  %v580_v12 = vld [vmem:[%s781_s1 + $0x8] sm:$0xff]  ;;  %v582_v20 = vld [vmem:[%s781_s1 + $0x18] sm:$0xff] }
   0x4   :  { %v109_v4 = vpack.c.b16 %v107_v2, %v107_v2  ;;  %v570_v11 = vld [vmem:[%s782_s0] sm:$0xff]  ;;  %v571_v13 = vld [vmem:[%s782_s0 + $0x8] sm:$0xff]  ;;  %v573_v21 = vld [vmem:[%s782_s0 + $0x18] sm:$0xff] }
   0x5   :  { %v236_v5 = vpack.c.b16 %v234_v3, %v234_v3  ;;  %v583_v14 = vld [vmem:[%s781_s1 + $0x20] sm:$0xff]  ;;  %v584_v18 = vld [vmem:[%s781_s1 + $0x28] sm:$0xff]  ;;  %v585_v22 = vld [vmem:[%s781_s1 + $0x30] sm:$0xff] }
   0x6   :  { %v138_v6 = vsel %vm136_vm0, %v109_v4, 0  ;;  %v574_v15 = vld [vmem:[%s782_s0 + $0x20] sm:$0xff]  ;;  %v575_v19 = vld [vmem:[%s782_s0 + $0x28] sm:$0xff]  ;;  %v576_v23 = vld [vmem:[%s782_s0 + $0x30] sm:$0xff] }
   0x7   :  { %v263_v7 = vsel %vm136_vm0, %v236_v5, 0  ;;  %146 = vmatpush.bf16.msra.mxu0 %v138_v6  ;;  %588 = vmatpush.bf16.msra.mxu2 %v138_v6  ;;  %v586_v24 = vld [vmem:[%s781_s1 + $0x38] sm:$0xff]  ;;  %v727_v26 = vld [vmem:[%s783_s5] ss:$0 sm:$0xff] }
   0x8   :  { %271 = vmatpush.bf16.msra.mxu1 %v263_v7  ;;  %590 = vmatpush.bf16.msra.mxu3 %v263_v7  ;;  %v577_v25 = vld [vmem:[%s782_s0 + $0x38] sm:$0xff] }
   0xb   :  { %147 = vmatpush.bf16.msra.mxu0 %v587_v8  ;;  %589 = vmatpush.bf16.msra.mxu2 %v587_v8 }
   0xc   :  { %272 = vmatpush.bf16.msra.mxu1 %v578_v9  ;;  %591 = vmatpush.bf16.msra.mxu3 %v578_v9 }
   0xe   :  { %513 = vmatmul.msk.bf16.vlgmr.msra.gmra.mxu0 %vm111_vm1, %v579_v10  ;;  %517 = vmatmul.msk.bf16.vlgmr.msra.gmra.mxu2 %vm111_vm1, %v583_v14 }
   0xf   :  { %557 = vmatmul.msk.bf16.vlgmr.msra.gmra.mxu1 %vm111_vm1, %v570_v11  ;;  %561 = vmatmul.msk.bf16.vlgmr.msra.gmra.mxu3 %vm111_vm1, %v574_v15 }
  0x1e   :  { %514 = vmatmul.msk.bf16.gmra.mxu0 %vm111_vm1, %v580_v12  ;;  %518 = vmatmul.msk.bf16.gmra.mxu2 %vm111_vm1, %v584_v18 }
  0x1f   :  { %558 = vmatmul.msk.bf16.gmra.mxu1 %vm111_vm1, %v571_v13  ;;  %562 = vmatmul.msk.bf16.gmra.mxu3 %vm111_vm1, %v575_v19 }
  0x2e   :  { %515 = vmatmul.msk.bf16.gmra.mxu0 %vm111_vm1, %v581_v16  ;;  %519 = vmatmul.msk.bf16.gmra.mxu2 %vm111_vm1, %v585_v22 }
  0x2f   :  { %559 = vmatmul.msk.bf16.gmra.mxu1 %vm111_vm1, %v572_v17  ;;  %563 = vmatmul.msk.bf16.gmra.mxu3 %vm111_vm1, %v576_v23 }
  0x3e   :  { %516 = vmatmul.msk.bf16.gmra.mxu0 %vm111_vm1, %v582_v20  ;;  %520 = vmatmul.msk.bf16.gmra.mxu2 %vm111_vm1, %v586_v24 }
  0x3f   :  { %560 = vmatmul.msk.bf16.gmra.mxu1 %vm111_vm1, %v573_v21  ;;  %564 = vmatmul.msk.bf16.gmra.mxu3 %vm111_vm1, %v577_v25 }
  0x8b   :  { %v149_v27 = vpop.f32.mrf.mxu0 }
  0x8c   :  { %v274_v28 = vpop.f32.mrf.mxu1 }
  0x8d   :  { %v275_v29 = vadd.f32 %v274_v28, %v149_v27 }
  0x8f   :  { %v318_v30 = vadd.f32 %v727_v26, %v275_v29 }
  0x91   :  { %334 = vxpose.xlu0.b32.start [1/16] (narrow) %v318_v30, 32  ;;  %v169_v51 = vpop.f32.mrf.mxu2 }
  0x92   :  { %v294_v52 = vpop.f32.mrf.mxu3 }
  0x93   :  { %v151_v31 = vpop.f32.mrf.mxu0  ;;  %v295_v63 = vadd.f32 %v294_v52, %v169_v51 }
  0x94   :  { %v276_v32 = vpop.f32.mrf.mxu1 }
  0x95   :  { %v277_v33 = vadd.f32 %v276_v32, %v151_v31  ;;  %v326_v0 = vadd.f32 %v727_v26, %v295_v63 }
  0x97   :  { %v319_v34 = vadd.f32 %v727_v26, %v277_v33 }
  0x99   :  { %335 = vxpose.xlu0.b32.cont [2/16] (narrow) %v319_v34, 32  ;;  %v171_v57 = vpop.f32.mrf.mxu2 }
  0x9a   :  { %v296_v58 = vpop.f32.mrf.mxu3 }
  0x9b   :  { %v154_v35 = vpop.f32.mrf.mxu0  ;;  %v297_v3 = vadd.f32 %v296_v58, %v171_v57 }
  0x9c   :  { %v279_v36 = vpop.f32.mrf.mxu1 }
  0x9d   :  { %v280_v37 = vadd.f32 %v279_v36, %v154_v35  ;;  %v327_v4 = vadd.f32 %v727_v26, %v297_v3 }
  0x9f   :  { %v320_v38 = vadd.f32 %v727_v26, %v280_v37 }
  0xa1   :  { %336 = vxpose.xlu0.b32.cont [3/16] (narrow) %v320_v38, 32  ;;  %v174_v1 = vpop.f32.mrf.mxu2 }
  0xa2   :  { %v299_v2 = vpop.f32.mrf.mxu3 }
  0xa3   :  { %v156_v39 = vpop.f32.mrf.mxu0  ;;  %v300_v7 = vadd.f32 %v299_v2, %v174_v1 }
  0xa4   :  { %v281_v40 = vpop.f32.mrf.mxu1 }
  0xa5   :  { %v282_v41 = vadd.f32 %v281_v40, %v156_v39  ;;  %v328_v8 = vadd.f32 %v727_v26, %v300_v7 }
  0xa7   :  { %v321_v42 = vadd.f32 %v727_v26, %v282_v41 }
  0xa9   :  { %337 = vxpose.xlu0.b32.cont [4/16] (narrow) %v321_v42, 32  ;;  %v176_v5 = vpop.f32.mrf.mxu2 }
  0xaa   :  { %v301_v6 = vpop.f32.mrf.mxu3 }
  0xab   :  { %v159_v43 = vpop.f32.mrf.mxu0  ;;  %v302_v11 = vadd.f32 %v301_v6, %v176_v5 }
  0xac   :  { %v284_v44 = vpop.f32.mrf.mxu1 }
  0xad   :  { %v285_v45 = vadd.f32 %v284_v44, %v159_v43  ;;  %v329_v12 = vadd.f32 %v727_v26, %v302_v11 }
  0xaf   :  { %v322_v46 = vadd.f32 %v727_v26, %v285_v45 }
  0xb1   :  { %338 = vxpose.xlu0.b32.cont [5/16] (narrow) %v322_v46, 32  ;;  %v179_v9 = vpop.f32.mrf.mxu2 }
  0xb2   :  { %v304_v10 = vpop.f32.mrf.mxu3 }
  0xb3   :  { %v161_v47 = vpop.f32.mrf.mxu0  ;;  %v305_v13 = vadd.f32 %v304_v10, %v179_v9 }
  0xb4   :  { %v286_v48 = vpop.f32.mrf.mxu1 }
  0xb5   :  { %v287_v49 = vadd.f32 %v286_v48, %v161_v47  ;;  %v330_v16 = vadd.f32 %v727_v26, %v305_v13 }
  0xb7   :  { %v323_v50 = vadd.f32 %v727_v26, %v287_v49 }
  0xb9   :  { %339 = vxpose.xlu0.b32.cont [6/16] (narrow) %v323_v50, 32  ;;  %v181_v14 = vpop.f32.mrf.mxu2 }
  0xba   :  { %v306_v15 = vpop.f32.mrf.mxu3 }
  0xbb   :  { %v164_v53 = vpop.f32.mrf.mxu0  ;;  %v307_v17 = vadd.f32 %v306_v15, %v181_v14 }
  0xbc   :  { %v289_v54 = vpop.f32.mrf.mxu1 }
  0xbd   :  { %v290_v55 = vadd.f32 %v289_v54, %v164_v53  ;;  %v331_v20 = vadd.f32 %v727_v26, %v307_v17 }
  0xbf   :  { %v324_v56 = vadd.f32 %v727_v26, %v290_v55 }
  0xc1   :  { %340 = vxpose.xlu0.b32.cont [7/16] (narrow) %v324_v56, 32  ;;  %v184_v18 = vpop.f32.mrf.mxu2 }
  0xc2   :  { %v309_v19 = vpop.f32.mrf.mxu3 }
  0xc3   :  { %v166_v59 = vpop.f32.mrf.mxu0  ;;  %v310_v21 = vadd.f32 %v309_v19, %v184_v18 }
  0xc4   :  { %v291_v60 = vpop.f32.mrf.mxu1 }
  0xc5   :  { %v292_v61 = vadd.f32 %v291_v60, %v166_v59  ;;  %v332_v22 = vadd.f32 %v727_v26, %v310_v21 }
  0xc7   :  { %v325_v62 = vadd.f32 %v727_v26, %v292_v61 }
  0xc9   :  { %341 = vxpose.xlu0.b32.cont [8/16] (narrow) %v325_v62, 32  ;;  %v186_v23 = vpop.f32.mrf.mxu2 }
  0xca   :  { %v311_v24 = vpop.f32.mrf.mxu3 }
  0xcb   :  { %v312_v25 = vadd.f32 %v311_v24, %v186_v23 }
  0xcd   :  { %v333_v27 = vadd.f32 %v727_v26, %v312_v25 }
  0xd1   :  { %342 = vxpose.xlu0.b32.cont [9/16] (narrow) %v326_v0, 32 }
  0xd9   :  { %343 = vxpose.xlu0.b32.cont [10/16] (narrow) %v327_v4, 32 }
  0xe1   :  { %344 = vxpose.xlu0.b32.cont [11/16] (narrow) %v328_v8, 32 }
  0xe9   :  { %345 = vxpose.xlu0.b32.cont [12/16] (narrow) %v329_v12, 32 }
  0xf1   :  { %346 = vxpose.xlu0.b32.cont [13/16] (narrow) %v330_v16, 32 }
  0xf9   :  { %347 = vxpose.xlu0.b32.cont [14/16] (narrow) %v331_v20, 32 }
 0x101   :  { %348 = vxpose.xlu0.b32.cont [15/16] (narrow) %v332_v22, 32 }
 0x109   :  { %349 = vxpose.xlu0.b32.end [16/16] (narrow) %v333_v27, 32 }
 0x135   :  { %v350_v28 = vpop.trf.xlu0 }
 0x136   :  { %v565_v29 = vmul.f32 -1.442695, %v350_v28 }
 0x138   :  { %593 = vpow2.f32 %v565_v29 }
 0x13d   :  { %v351_v30 = vpop.trf.xlu0 }
 0x13e   :  { %v566_v31 = vmul.f32 -1.442695, %v351_v30  ;;  %v594_v32 = vpop.eup %593 }
 0x13f   :  { %v745_v36 = vadd.f32 1.0, %v594_v32 }
 0x140   :  { %595 = vpow2.f32 %v566_v31  ;;  %v451_v31 = vld [vmem:[%s784_s2] sm:$0x1] }
 0x141   :  { %vm379_vm2 = vweird.f32 %v745_v36  ;;  %v383_v56 = vand.u32 2147483647, %v745_v36  ;;  %v385_v57 = vand.u32 2147483648, %v745_v36 }
 0x143   :  { %v386_v14 = vor.u32 1.1754944e-38, %v385_v57  ;;  %vm384_vm15 = vcmp.eq.f32.partialorder %v383_v56, 8.507059e+37 }
 0x145   :  { %v352_v33 = vpop.trf.xlu0 }
 0x146   :  { %v596_v34 = vpop.eup %595  ;;  %v567_v35 = vmul.f32 -1.442695, %v352_v33 }
 0x147   :  { %v373_v37 = vadd.f32 1.0, %v596_v34 }
 0x148   :  { %597 = vpow2.f32 %v567_v35 }
 0x149   :  { %599 = vrcp.f32 %v745_v36  ;;  %vm394_vm7 = vweird.f32 %v373_v37  ;;  %v398_v1 = vand.u32 2147483647, %v373_v37  ;;  %v400_v2 = vand.u32 2147483648, %v373_v37 }
 0x14a   :  { %601 = vrcp.f32 %v373_v37 }
 0x14b   :  { %v401_v15 = vor.u32 1.1754944e-38, %v400_v2  ;;  %vm399_vm0 = vcmp.eq.f32.partialorder %v398_v1, 8.507059e+37 }
 0x14d   :  { %v353_v38 = vpop.trf.xlu0 }
 0x14e   :  { %v598_v26 = vpop.eup %597  ;;  %v568_v39 = vmul.f32 -1.442695, %v353_v38 }
 0x14f   :  { %v410_v40 = vadd.f32 1.0, %v598_v26  ;;  %v600_v41 = vpop.eup %599 }
 0x150   :  { %603 = vpow2.f32 %v568_v39  ;;  %v602_v42 = vpop.eup %601  ;;  %v375_v43 = vmul.f32 %v600_v41, %v745_v36  ;;  %vm380_vm4 = vweird.f32 %v600_v41 }
 0x151   :  { %605 = vrcp.f32 %v410_v40  ;;  %v390_v45 = vmul.f32 %v602_v42, %v373_v37  ;;  %vm395_vm5 = vweird.f32 %v602_v42  ;;  %v423_v61 = vand.u32 2147483648, %v410_v40  ;;  %vm758_vm9 = vmor %vm379_vm2, %vm380_vm4 }
 0x152   :  { %v376_v49 = vsub.f32 1.0, %v375_v43  ;;  %vm417_vm6 = vweird.f32 %v410_v40  ;;  %v421_v63 = vand.u32 2147483647, %v410_v40  ;;  %vm767_vm11 = vmor %vm394_vm7, %vm395_vm5 }
 0x153   :  { %v391_v50 = vsub.f32 1.0, %v390_v45  ;;  %v424_v11 = vor.u32 1.1754944e-38, %v423_v61 }
 0x154   :  { %v377_v53 = vmul.f32 %v600_v41, %v376_v49  ;;  %vm422_vm12 = vcmp.eq.f32.partialorder %v421_v63, 8.507059e+37 }
 0x155   :  { %v392_v54 = vmul.f32 %v602_v42, %v391_v50 }
 0x156   :  { %v604_v44 = vpop.eup %603  ;;  %v378_v60 = vadd.f32 %v600_v41, %v377_v53 }
 0x157   :  { %v606_v46 = vpop.eup %605  ;;  %v411_v47 = vadd.f32 1.0, %v604_v44  ;;  %v393_v62 = vadd.f32 %v602_v42, %v392_v54 }
 0x158   :  { %v413_v48 = vmul.f32 %v606_v46, %v410_v40  ;;  %vm418_vm3 = vweird.f32 %v606_v46  ;;  %v382_v9 = vsel %vm758_vm9, %v600_v41, %v378_v60 }
 0x159   :  { %607 = vrcp.f32 %v411_v47  ;;  %vm752_vm8 = vmor %vm417_vm6, %vm418_vm3  ;;  %v438_v4 = vand.u32 2147483648, %v411_v47  ;;  %v436_v8 = vand.u32 2147483647, %v411_v47  ;;  %v397_v12 = vsel %vm767_vm11, %v602_v42, %v393_v62 }
 0x15a   :  { %v414_v51 = vsub.f32 1.0, %v413_v48  ;;  %vm432_vm13 = vweird.f32 %v411_v47  ;;  %v387_v19 = vsel %vm384_vm15, %v386_v14, %v382_v9  ;;  %v402_v20 = vsel %vm399_vm0, %v401_v15, %v397_v12 }
 0x15b   :  { %v439_v17 = vor.u32 1.1754944e-38, %v438_v4  ;;  %vm437_vm1 = vcmp.eq.f32.partialorder %v436_v8, 8.507059e+37 }
 0x15c   :  { %v415_v52 = vmul.f32 %v606_v46, %v414_v51 }
 0x15e   :  { %v416_v58 = vadd.f32 %v606_v46, %v415_v52 }
 0x15f   :  { %v608_v55 = vpop.eup %607 }
 0x160   :  { %v428_v59 = vmul.f32 %v608_v55, %v411_v47  ;;  %v420_v6 = vsel %vm752_vm8, %v606_v46, %v416_v58  ;;  %vm433_vm10 = vweird.f32 %v608_v55 }
 0x161   :  { %v425_v16 = vsel %vm422_vm12, %v424_v11, %v420_v6  ;;  %vm434_vm14 = vmor %vm432_vm13, %vm433_vm10 }
 0x162   :  { %v429_v0 = vsub.f32 1.0, %v428_v59  ;;  %v442_v22 = vmul.f32 %v425_v16, %v387_v19 }
 0x164   :  { %v430_v7 = vmul.f32 %v608_v55, %v429_v0 }
 0x166   :  { %v431_v13 = vadd.f32 %v608_v55, %v430_v7 }
 0x168   :  { %v435_v18 = vsel %vm434_vm14, %v608_v55, %v431_v13 }
 0x169   :  { %v440_v21 = vsel %vm437_vm1, %v439_v17, %v435_v18 }
 0x16a   :  { %v443_v23 = vmul.f32 %v440_v21, %v402_v20 }
 0x16c   :  { %v444_v24 = vadd.f32 %v443_v23, %v442_v22 }
 0x16e   :  { %v445_v25 = vrot.slane %v444_v24, 4 }
 0x170   :  { %v446_v27 = vadd.f32 %v445_v25, %v444_v24 }
 0x172   :  { %v447_v28 = vrot.slane %v446_v27, 2 }
 0x174   :  { %v448_v29 = vadd.f32 %v447_v28, %v446_v27 }
 0x176   :  { %v449_v30 = vrot.slane %v448_v29, 1 }
 0x178   :  { %v450_v32 = vadd.f32 %v449_v30, %v448_v29 }
 0x17a   :  { %v452_v33 = vsub.f32 %v450_v32, %v451_v31 }
 0x17c   :  { %v569_v34 = vmul.f32 -1.442695, %v452_v33 }
 0x17e   :  { %609 = vpow2.f32 %v569_v34 }
 0x184   :  { %v610_v35 = vpop.eup %609 }
 0x185   :  { %v456_v36 = vadd.f32 1.0, %v610_v35 }
 0x187   :  { %611 = vrcp.f32 %v456_v36  ;;  %v468_v39 = vand.u32 2147483648, %v456_v36  ;;  %v466_v41 = vand.u32 2147483647, %v456_v36  ;;  %vm462_vm3 = vweird.f32 %v456_v36 }
 0x189   :  { %v469_v43 = vor.u32 1.1754944e-38, %v468_v39  ;;  %vm467_vm5 = vcmp.eq.f32.partialorder %v466_v41, 8.507059e+37 }
 0x18d   :  { %v612_v37 = vpop.eup %611 }
 0x18e   :  { %v458_v38 = vmul.f32 %v612_v37, %v456_v36  ;;  %vm463_vm2 = vweird.f32 %v612_v37 }
 0x18f   :  { %vm464_vm4 = vmor %vm462_vm3, %vm463_vm2 }
 0x190   :  { %v459_v26 = vsub.f32 1.0, %v458_v38 }
 0x192   :  { %v460_v40 = vmul.f32 %v612_v37, %v459_v26 }
 0x194   :  { %v461_v42 = vadd.f32 %v612_v37, %v460_v40 }
 0x196   :  { %v465_v44 = vsel %vm464_vm4, %v612_v37, %v461_v42 }
 0x197   :  { %v470_v45 = vsel %vm467_vm5, %v469_v43, %v465_v44 }
 0x198   :  { %472 = vst [vmem:[%s785_s6] sm:$0x1] %v470_v45 }

</bundles_post_ra>
